<compile_context>
chip_gen: v6e
topology: v6e:2x2x1
jax: 0.10.0
libtpu: 0.0.40
codegen_flags: <defaults>
</compile_context>

<pallas_src>
import functools

import jax
import jax.numpy as jnp
from jax.experimental import pallas as pl
from jax.experimental.pallas import tpu as pltpu

_TB_MAX = 65536  # max lane-dense batch tile (f32 temporaries ~128 B/col -> ~8 MiB)


def _policy_kernel(x_ref, w1_ref, b1_ref, w2_ref, b2_ref, o_ref, *, bf16_act):
    x = x_ref[...]        # (3, TB)  f32, batch on lanes
    w1 = w1_ref[...]      # (20, 3)  f32  (PyTorch (out, in) layout)
    b1 = b1_ref[...]      # (20, 1)  f32
    w2 = w2_ref[...]      # (20, 1)  f32  (l2 weight as a column)
    b2 = b2_ref[0]        # scalar   f32 from SMEM

    # Layer 1: h[n, b] = sum_k w1[n, k] * x[k, b] + b1[n]
    # K = 3 -> three VPU broadcast multiply-adds; keep the MXU out of it.
    h = (w1[:, 0:1] * x[0:1, :]
         + w1[:, 1:2] * x[1:2, :]
         + w1[:, 2:3] * x[2:3, :]
         + b1)                                              # (20, TB)

    if bf16_act:
        # EUP is the binding slot on v6e/v7x: bf16 tanh runs ~2x the f32 rate.
        # Accuracy tradeoff (~1e-2 rel); accumulate layer-2 sum in f32.
        h_bf = jnp.tanh(h.astype(jnp.bfloat16))             # EUP, bf16
        p = (w2.astype(jnp.bfloat16) * h_bf).astype(jnp.float32)
        y = jnp.sum(p, axis=0, keepdims=True) + b2          # (1, TB)
    else:
        h = jnp.tanh(h)                                      # EUP, f32
        y = jnp.sum(w2 * h, axis=0, keepdims=True) + b2      # (1, TB)

    o_ref[...] = y.astype(o_ref.dtype)


def _pick_batch_tiling(B, tb_max=_TB_MAX):
    """Return (tile, padded_batch). 128-aligned, >=2 grid steps when worthwhile."""
    b128 = max(pl.cdiv(B, 128) * 128, 128)
    if b128 <= 256:
        tb = b128                                   # tiny batch: single tile
    else:
        # ~half the batch, 128-aligned -> at least 2 grid steps so the
        # "parallel" batch axis can shard across v7x's 2 TensorCores.
        half = pl.cdiv(b128, 256) * 128
        tb = min(tb_max, half)
    b_pad = pl.cdiv(b128, tb) * tb
    return tb, b_pad


def policy_forward_feature_major(x_t, w1, b1, w2, b2, *, bf16_act=False):
    """Forward pass with x already in feature-major layout.

    x_t: (3, B) float32 — batch on the lane axis (no wrapper transpose needed).
    Returns (1, B) float32.
    """
    _, B = x_t.shape
    tb, B_pad = _pick_batch_tiling(B)

    x_t = x_t.astype(jnp.float32)
    if B_pad != B:
        x_t = jnp.pad(x_t, ((0, 0), (0, B_pad - B)))        # zero-pad ragged tail

    w1_f = w1.astype(jnp.float32)                            # (20, 3)
    b1_col = b1.reshape(20, 1).astype(jnp.float32)
    w2_col = w2.reshape(20, 1).astype(jnp.float32)
    b2_s = b2.reshape(1).astype(jnp.float32)

    grid = (B_pad // tb,)
    kernel = functools.partial(_policy_kernel, bf16_act=bf16_act)

    y_pad = pl.pallas_call(
        kernel,
        out_shape=jax.ShapeDtypeStruct((1, B_pad), jnp.float32),
        grid=grid,
        in_specs=[
            pl.BlockSpec((3, tb), lambda i: (0, i)),             # x, tiled over batch
            pl.BlockSpec((20, 3), lambda i: (0, 0)),             # w1, resident
            pl.BlockSpec((20, 1), lambda i: (0, 0)),             # b1, resident
            pl.BlockSpec((20, 1), lambda i: (0, 0)),             # w2, resident
            pl.BlockSpec(memory_space=pltpu.MemorySpace.SMEM),   # b2 scalar in SMEM
        ],
        out_specs=pl.BlockSpec((1, tb), lambda i: (0, i)),       # lane-dense output
        compiler_params=pltpu.CompilerParams(
            dimension_semantics=("parallel",)),                  # megacore on v7x
    )(x_t, w1_f, b1_col, w2_col, b2_s)

    return y_pad[:, :B]                                          # (1, B)


def policy_forward(x, w1, b1, w2, b2, *, bf16_act=False):
    """PyTorch-shaped forward pass.

    x:  (B, 3)  float32
    w1: (20, 3) float32   (nn.Linear(3, 20).weight, PyTorch (out, in) layout)
    b1: (20,)   float32
    w2: (1, 20) float32   (nn.Linear(20, 1).weight)
    b2: (1,)    float32
    returns (B, 1) float32

    Note: this does ONE transpose to feature-major; if the producer can supply
    x as (3, B), call policy_forward_feature_major directly and skip it.
    """
    B = x.shape[0]
    x_t = x.astype(jnp.float32).T                    # (3, B), single layout pass
    y = policy_forward_feature_major(x_t, w1, b1, w2, b2, bf16_act=bf16_act)
    return y.reshape(1, B).T                         # (B, 1)


def init_params(key):
    """Deterministic synthetic params matching nn.Linear(3,20) / nn.Linear(20,1)."""
    k1, k2, k3, k4 = jax.random.split(key, 4)
    # PyTorch nn.Linear weight layout is (out_features, in_features).
    w1 = jax.random.uniform(k1, (20, 3), jnp.float32, -0.5, 0.5)
    b1 = jax.random.uniform(k2, (20,), jnp.float32, -0.5, 0.5)
    w2 = jax.random.uniform(k3, (1, 20), jnp.float32, -0.5, 0.5)
    b2 = jax.random.uniform(k4, (1,), jnp.float32, -0.5, 0.5)
    return w1, b1, w2, b2


if __name__ == "__main__":
    key = jax.random.PRNGKey(0)
    kp, kx1, kx2 = jax.random.split(key, 3)
    w1, b1, w2, b2 = init_params(kp)

    def ref(x):
        # Pure-JAX reference (PyTorch semantics): y = tanh(x @ W1^T + b1) @ W2^T + b2
        return jnp.tanh(x @ w1.T + b1) @ w2.T + b2

    # Small batch (single-tile path).
    B1 = 8
    x1 = jax.random.normal(kx1, (B1, 3), jnp.float32)
    y1 = jax.block_until_ready(policy_forward(x1, w1, b1, w2, b2))
    assert y1.shape == (B1, 1)
    assert jnp.allclose(y1, ref(x1), atol=1e-5, rtol=1e-5)

    # Ragged batch exercising the multi-step ("parallel") grid + tail padding,
    # via the feature-major (no-transpose) entry point.
    B2 = 300
    x2 = jax.random.normal(kx2, (B2, 3), jnp.float32)
    y2 = jax.block_until_ready(
        policy_forward_feature_major(x2.T, w1, b1, w2, b2))
    assert y2.shape == (1, B2)
    assert jnp.allclose(y2.T, ref(x2), atol=1e-5, rtol=1e-5)

    print("KERNEL_OK")
</pallas_src>

<mosaic_0001>
module attributes {stable_mosaic.version = 11 : i64} {
  func.func @_policy_kernel(%arg0: i32, %arg1: memref<3x128xf32, #tpu.memory_space<vmem>>, %arg2: memref<20x3xf32, #tpu.memory_space<vmem>>, %arg3: memref<20x1xf32, #tpu.memory_space<vmem>>, %arg4: memref<20x1xf32, #tpu.memory_space<vmem>>, %arg5: memref<1xf32, #tpu.memory_space<smem>>, %arg6: memref<1x128xf32, #tpu.memory_space<vmem>>) attributes {dimension_semantics = [#tpu.dimension_semantics<parallel>], iteration_bounds = array<i64: 1>, scalar_prefetch = 0 : i64, scratch_operands = 0 : i64, tpu.core_type = #tpu.core_type<tc>, window_params = [{transform_indices = @transform_0, window_bounds = array<i64: 3, 128>}, {pipeline_mode = #tpu.pipeline_mode<synchronous>, transform_indices = @transform_1, window_bounds = array<i64: 20, 3>}, {pipeline_mode = #tpu.pipeline_mode<synchronous>, transform_indices = @transform_2, window_bounds = array<i64: 20, 1>}, {pipeline_mode = #tpu.pipeline_mode<synchronous>, transform_indices = @transform_3, window_bounds = array<i64: 20, 1>}, {transform_indices = @transform_4, window_bounds = array<i64: 1>}, {transform_indices = @transform_5, window_bounds = array<i64: 1, 128>}]} {
    %c0 = arith.constant 0 : index
    %c0_0 = arith.constant 0 : index
    %0 = vector.load %arg1[%c0, %c0_0] : memref<3x128xf32, #tpu.memory_space<vmem>>, vector<3x128xf32>
    %c0_1 = arith.constant 0 : index
    %c0_2 = arith.constant 0 : index
    %1 = vector.load %arg2[%c0_1, %c0_2] : memref<20x3xf32, #tpu.memory_space<vmem>>, vector<20x3xf32>
    %c0_3 = arith.constant 0 : index
    %c0_4 = arith.constant 0 : index
    %2 = vector.load %arg3[%c0_3, %c0_4] : memref<20x1xf32, #tpu.memory_space<vmem>>, vector<20x1xf32>
    %c0_5 = arith.constant 0 : index
    %c0_6 = arith.constant 0 : index
    %3 = vector.load %arg4[%c0_5, %c0_6] : memref<20x1xf32, #tpu.memory_space<vmem>>, vector<20x1xf32>
    %c0_7 = arith.constant 0 : index
    %4 = memref.load %arg5[%c0_7] : memref<1xf32, #tpu.memory_space<smem>>
    %5 = vector.extract_strided_slice %1 {offsets = [0, 0], sizes = [20, 1], strides = [1, 1]} : vector<20x3xf32> to vector<20x1xf32>
    %6 = vector.extract_strided_slice %0 {offsets = [0, 0], sizes = [1, 128], strides = [1, 1]} : vector<3x128xf32> to vector<1x128xf32>
    %7 = vector.broadcast %5 : vector<20x1xf32> to vector<20x128xf32>
    %8 = vector.broadcast %6 : vector<1x128xf32> to vector<20x128xf32>
    %9 = arith.mulf %7, %8 : vector<20x128xf32>
    %10 = vector.extract_strided_slice %1 {offsets = [0, 1], sizes = [20, 1], strides = [1, 1]} : vector<20x3xf32> to vector<20x1xf32>
    %11 = vector.extract_strided_slice %0 {offsets = [1, 0], sizes = [1, 128], strides = [1, 1]} : vector<3x128xf32> to vector<1x128xf32>
    %12 = vector.broadcast %10 : vector<20x1xf32> to vector<20x128xf32>
    %13 = vector.broadcast %11 : vector<1x128xf32> to vector<20x128xf32>
    %14 = arith.mulf %12, %13 : vector<20x128xf32>
    %15 = arith.addf %9, %14 : vector<20x128xf32>
    %16 = vector.extract_strided_slice %1 {offsets = [0, 2], sizes = [20, 1], strides = [1, 1]} : vector<20x3xf32> to vector<20x1xf32>
    %17 = vector.extract_strided_slice %0 {offsets = [2, 0], sizes = [1, 128], strides = [1, 1]} : vector<3x128xf32> to vector<1x128xf32>
    %18 = vector.broadcast %16 : vector<20x1xf32> to vector<20x128xf32>
    %19 = vector.broadcast %17 : vector<1x128xf32> to vector<20x128xf32>
    %20 = arith.mulf %18, %19 : vector<20x128xf32>
    %21 = arith.addf %15, %20 : vector<20x128xf32>
    %22 = vector.broadcast %2 : vector<20x1xf32> to vector<20x128xf32>
    %23 = arith.addf %21, %22 : vector<20x128xf32>
    %24 = math.tanh %23 : vector<20x128xf32>
    %25 = vector.broadcast %3 : vector<20x1xf32> to vector<20x128xf32>
    %26 = arith.mulf %25, %24 : vector<20x128xf32>
    %cst = arith.constant dense<0.000000e+00> : vector<128xf32>
    %27 = vector.multi_reduction <add>, %26, %cst [0] : vector<20x128xf32> to vector<128xf32>
    %28 = vector.shape_cast %27 : vector<128xf32> to vector<1x128xf32>
    %29 = vector.broadcast %4 : f32 to vector<1x128xf32>
    %30 = arith.addf %28, %29 : vector<1x128xf32>
    %c0_8 = arith.constant 0 : index
    %c0_9 = arith.constant 0 : index
    %31 = vector.load %arg6[%c0_8, %c0_9] : memref<1x128xf32, #tpu.memory_space<vmem>>, vector<1x128xf32>
    tpu.vector_store %arg6[%c0_8, %c0_9], %30 {strides = array<i32>} : memref<1x128xf32, #tpu.memory_space<vmem>>, vector<1x128xf32>,
    return
  }
  func.func @transform_0(%arg0: i32) -> (i32, i32) {
    %c0_i32 = arith.constant 0 : i32
    %c0_i32_0 = arith.constant 0 : i32
    return %c0_i32, %arg0 : i32, i32
  }
  func.func @transform_1(%arg0: i32) -> (i32, i32) {
    %c0_i32 = arith.constant 0 : i32
    %c0_i32_0 = arith.constant 0 : i32
    %c0_i32_1 = arith.constant 0 : i32
    return %c0_i32, %c0_i32_0 : i32, i32
  }
  func.func @transform_2(%arg0: i32) -> (i32, i32) {
    %c0_i32 = arith.constant 0 : i32
    %c0_i32_0 = arith.constant 0 : i32
    %c0_i32_1 = arith.constant 0 : i32
    return %c0_i32, %c0_i32_0 : i32, i32
  }
  func.func @transform_3(%arg0: i32) -> (i32, i32) {
    %c0_i32 = arith.constant 0 : i32
    %c0_i32_0 = arith.constant 0 : i32
    %c0_i32_1 = arith.constant 0 : i32
    return %c0_i32, %c0_i32_0 : i32, i32
  }
  func.func @transform_4(%arg0: i32) -> i32 {
    %c0_i32 = arith.constant 0 : i32
    %c0_i32_0 = arith.constant 0 : i32
    return %c0_i32 : i32
  }
  func.func @transform_5(%arg0: i32) -> (i32, i32) {
    %c0_i32 = arith.constant 0 : i32
    %c0_i32_0 = arith.constant 0 : i32
    return %c0_i32, %arg0 : i32, i32
  }
}

</mosaic_0001>

<bundles_post_ra>
// kernel: tpu_custom_call.1
= control target key start
LH: loop header
LB: loop body
LE: loop exit
PB: predicated region body
PF: predicated region fallthrough
CT: control target
= control target key end

     0   :  { %v203_v1 = vmov 1   ;;  %v204_v2 = vmov 0   ;;  %s273_s0 = inlined_call_operand.vmem [shape: f32[3,128], index: 0, kind: input, shape index: {}]   ;;  %s274_s1 = inlined_call_operand.vmem [shape: f32[20,3], index: 1, kind: input, shape index: {}]   ;;  %s275_s2 = inlined_call_operand.vmem [shape: f32[20,1], index: 2, kind: input, shape index: {}]   ;;  %s276_s3 = inlined_call_operand.vmem [shape: f32[20,1], index: 3, kind: input, shape index: {}]   ;;  %s277_s4 = inlined_call_operand.<no memory space> [shape: f32[1], index: 4, kind: input, shape index: {}]   ;;  %s278_s5 = inlined_call_operand.hbm [shape: f32[1,128], index: 5, kind: output, shape index: {}]  }
   0x1   :  { %v23_v0 = vld [vmem:[%s274_s1] sm:$0xff]  ;;  %170 = vset.pattern.permute.xlu1 %v203_v1  ;;  %169 = vset.pattern.permute.xlu0 %v204_v2  ;;  %v24_v3 = vld [vmem:[%s274_s1 + $0x8] sm:$0xff] }
   0x2   :  { %56 = vperm.xlu1 %170, %v23_v0   ;;  %35 = vperm.xlu0 %169, %v23_v0  }
   0x3   :  { %11 = vsyncpa [#allocation4], 0  ;;  %v25_v4 = vld [vmem:[%s274_s1 + $0x10] sm:$0xf]  ;;  %v205_v5 = vmov 2   ;;  %v26_v6 = vld [vmem:[%s275_s2] sm:$0xff]  ;;  %v48_v12 = vlaneseq }
   0x4   :  { %v27_v7 = vld [vmem:[%s275_s2 + $0x8] sm:$0xff]  ;;  %v29_v8 = vld [vmem:[%s276_s3] sm:$0xff]  ;;  %v28_v9 = vld [vmem:[%s275_s2 + $0x10] sm:$0xf]  ;;  %vm139_vm0 = vcmask 1043456   ;;  %s206_s11 = smov [#allocation3]  }
   0x5   :  { %v31_v10 = vld [vmem:[%s276_s3 + $0x10] sm:$0xf]  ;;  %v30_v11 = vld [vmem:[%s276_s3 + $0x8] sm:$0xff]  ;;  %v49_v13 = vshrl.u32 %v48_v12, 7  ;;  %v22_v20 = vld [vmem:[%s273_s0] sm:$0x7] }
   0x6   :  { %60 = vperm.xlu1 %170, %v24_v3   ;;  %40 = vperm.xlu0 %169, %v24_v3   ;;  %s157_s12 = sshll.u32 %s206_s11, 4  ;;  %s158_s12 = int_to_ptr.vmem [resolvable:$true] %s157_s12 }
   0x7   :  { %v69_v16 = vsub.s32 1, %v49_v13  ;;  %v50_v17 = vsub.s32 0, %v49_v13  ;;  %v91_v21 = vsub.s32 2, %v49_v13  ;;  %s181_s13 = scalar_lea.vmem %s158_s12, 16  ;;  %s185_s14 = scalar_lea.vmem %s158_s12, 32 }
   0x8   :  { %p182_p0 = scmp.ne.s32.totalorder %s158_s12, %s181_s13  ;;  %p186_p1 = scmp.lt.s32.totalorder %s158_s12, %s158_s12 }
   0x9   :  { %v70_v22 = vrot.slane %v22_v20, %v69_v16  ;;  %v51_v23 = vrot.slane %v22_v20, %v50_v17  ;;  %v92_v26 = vrot.slane %v22_v20, %v91_v21  ;;  %p187_p2 = scmp.lt.s32.totalorder %s185_s14, %s181_s13 }
   0xa   :  { %64 = vperm.xlu1 %170, %v25_v4   ;;  %45 = vperm.xlu0 %169, %v25_v4  }
   0xb   :  { %p188_p3 = por %p187_p2, %p186_p1 }
   0xd   :  { %p189_p4 = pnand %p188_p3, %p182_p0 }
   0xe   :  { %172 = vset.pattern.permute.xlu1 %v205_v5  ;;  %171 = vset.pattern.permute.xlu0 %v205_v5 }
   0xf   :  { %82 = vperm.xlu1 %172, %v24_v3   ;;  %78 = vperm.xlu0 %171, %v23_v0  }
  0x13   :  { %86 = vperm.xlu1 %172, %v25_v4   ;;  %173 = vset.pattern.permute.xlu0 %v204_v2  ;;  %v148_v4 = vstv %s277_s4 }
  0x14   :  { %101 = vperm.xlu0 %173, %v26_v6  }
  0x17   :  { %174 = vset.pattern.permute.xlu1 %v204_v2 }
  0x18   :  { %106 = vperm.xlu1 %174, %v27_v7   ;;  %122 = vperm.xlu0 %173, %v29_v8  }
  0x1c   :  { %111 = vperm.xlu1 %174, %v28_v9   ;;  %132 = vperm.xlu0 %173, %v31_v10  }
  0x20   :  { %127 = vperm.xlu1 %174, %v30_v11  }
  0x7d   :  { %v57_v14 = vpop.permute.xlu1 %56  ;;  %v36_v15 = vpop.permute.xlu0 %35 }
  0x7e   :  { %v71_v27 = vmul.f32 %v70_v22, %v57_v14  ;;  %v52_v28 = vmul.f32 %v51_v23, %v36_v15 }
  0x80   :  { %v74_v34 = vadd.f32 %v71_v27, %v52_v28 }
  0x81   :  { %v61_v18 = vpop.permute.xlu1 %60  ;;  %v41_v19 = vpop.permute.xlu0 %40 }
  0x82   :  { %v72_v32 = vmul.f32 %v70_v22, %v61_v18  ;;  %v53_v33 = vmul.f32 %v51_v23, %v41_v19 }
  0x84   :  { %v75_v38 = vadd.f32 %v72_v32, %v53_v33 }
  0x85   :  { %v65_v24 = vpop.permute.xlu1 %64  ;;  %v46_v25 = vpop.permute.xlu0 %45 }
  0x86   :  { %v73_v39 = vmul.f32 %v70_v22, %v65_v24  ;;  %v54_v40 = vmul.f32 %v51_v23, %v46_v25 }
  0x88   :  { %v76_v46 = vadd.f32 %v73_v39, %v54_v40 }
  0x8a   :  { %v83_v29 = vpop.permute.xlu1 %82  ;;  %v79_v30 = vpop.permute.xlu0 %78 }
  0x8b   :  { %v93_v31 = vmul.f32 %v92_v26, %v79_v30  ;;  %v94_v35 = vmul.f32 %v92_v26, %v83_v29 }
  0x8d   :  { %v96_v37 = vadd.f32 %v93_v31, %v74_v34  ;;  %v97_v43 = vadd.f32 %v94_v35, %v75_v38 }
  0x8e   :  { %v87_v36 = vpop.permute.xlu1 %86 }
  0x8f   :  { %v102_v41 = vpop.permute.xlu0 %101  ;;  %v95_v42 = vmul.f32 %v92_v26, %v87_v36 }
  0x90   :  { %v114_v44 = vadd.f32 %v102_v41, %v96_v37 }
  0x91   :  { %v98_v48 = vadd.f32 %v95_v42, %v76_v46 }
  0x93   :  { %v107_v45 = vpop.permute.xlu1 %106  ;;  %v123_v51 = vpop.permute.xlu0 %122 }
  0x94   :  { %v115_v47 = vadd.f32 %v107_v45, %v97_v43 }
  0x96   :  { %175 = vtanh.f32 %v115_v47 }
  0x97   :  { %177 = vtanh.f32 %v114_v44  ;;  %v112_v49 = vpop.permute.xlu1 %111  ;;  %v133_v58 = vpop.permute.xlu0 %132 }
  0x98   :  { %v116_v50 = vadd.f32 %v112_v49, %v98_v48 }
  0x9a   :  { %179 = vtanh.f32 %v116_v50 }
  0x9b   :  { %v128_v54 = vpop.permute.xlu1 %127 }
  0xa3   :  { %v176_v52 = vpop.eup %175 }
  0xa4   :  { %v178_v53 = vpop.eup %177  ;;  %v136_v55 = vmul.f32 %v176_v52, %v128_v54 }
  0xa5   :  { %v135_v57 = vmul.f32 %v178_v53, %v123_v51 }
  0xa7   :  { %v180_v56 = vpop.eup %179  ;;  %v138_v60 = vadd.f32 %v136_v55, %v135_v57 }
  0xa8   :  { %v137_v59 = vmul.f32 %v180_v56, %v133_v58 }
  0xaa   :  { %v140_v61 = vsel %vm139_vm0, %v137_v59, 0.0 }
  0xab   :  { %v141_v62 = vadd.f32 %v140_v61, %v138_v60 }
  0xad   :  { %v142_v63 = vrot.slane %v141_v62, 4 }
  0xaf   :  { %v143_v0 = vadd.f32 %v142_v63, %v141_v62 }
  0xb1   :  { %v144_v1 = vrot.slane %v143_v0, 2 }
  0xb3   :  { %v145_v2 = vadd.f32 %v144_v1, %v143_v0 }
  0xb5   :  { %v146_v3 = vrot.slane %v145_v2, 1 }
  0xb7   :  { %v147_v5 = vadd.f32 %v146_v3, %v145_v2 }
  0xb9   :  { %v149_v6 = vadd.f32 %v148_v4, %v147_v5 }
  0xbb   :  { %150 = vst [vmem:[#allocation3] sm:$0x1] %v149_v6 }
  0xbc   :  { %192 = shalt.err (!%p189_p4)
}
  0xbd   :  { %160 = dma.vmem_to_hbm [thread:$0]  %s158_s12, 16, %s278_s5, [#allocation4]  }
  0xbe   :  { %201 = dma.done.wait [#allocation4], 16  }
  0xbf   :  { %202 = vsyncadd [#allocation4], 4294967280 }
  0xc0   :  { %164 = vsyncpa [#allocation4], 1 }

</bundles_post_ra>
